<compile_context>
chip_gen: v7x
topology: tpu7x:2x2x1
jax: 0.10.0
libtpu: 0.0.40
codegen_flags: <defaults>
</compile_context>

<pallas_src>
import jax
import jax.numpy as jnp
from jax.experimental import pallas as pl
from jax.experimental.pallas import tpu as pltpu


# Synthetic FT_COMPONENTS: srhealth_0 (4) + fatigue_0 (4) + insomnia_0 (3)
# + falls_0 (3) + depressed_0 (4) = 18 output logits total.
FT_COMPONENTS = (
    ["srhealth_0_%d" % i for i in range(4)]
    + ["fatigue_0_%d" % i for i in range(4)]
    + ["insomnia_0_%d" % i for i in range(3)]
    + ["falls_0_%d" % i for i in range(3)]
    + ["depressed_0_%d" % i for i in range(4)]
)
NUM_OUT = len(FT_COMPONENTS)  # 18

IN_DIM, H1, H2, H3 = 344, 250, 150, 100


def _round_up(x, m):
    return (x + m - 1) // m * m


# Lane-aligned (multiple-of-128) padded *output* dims of each layer -> unmasked
# stores and clean MXU N shapes.  The contraction (K) dims are NOT padded: the
# input stays at 344 columns and each layer consumes the previous layer's
# padded width (zero weight rows make that exactly equivalent).
H1_P = _round_up(H1, 128)        # 256
H2_P = _round_up(H2, 128)        # 256
H3_P = _round_up(H3, 128)        # 128
OUT_P = _round_up(NUM_OUT, 128)  # 128


def _mlp_kernel(x_ref, w1_ref, b1_ref, w2_ref, b2_ref, w3_ref, b3_ref,
                w4_ref, b4_ref, o_ref):
    cdt = w1_ref.dtype  # compute dtype for the MXU (bf16 by default, or f32)

    # Matmuls run in the weight dtype with f32 MXU accumulation; the bias-add /
    # ReLU epilogue stays f32 (biases are stored f32; v5e has no bf16 VALU).
    h = jnp.dot(x_ref[...].astype(cdt), w1_ref[...],
                preferred_element_type=jnp.float32)
    h = jnp.maximum(h + b1_ref[...], 0.0)      # Linear(344,250) -> Dropout(eval) -> ReLU

    h = jnp.dot(h.astype(cdt), w2_ref[...], preferred_element_type=jnp.float32)
    h = jnp.maximum(h + b2_ref[...], 0.0)      # Linear(250,150) -> Dropout(eval) -> ReLU

    h = jnp.dot(h.astype(cdt), w3_ref[...], preferred_element_type=jnp.float32)
    h = jnp.maximum(h + b3_ref[...], 0.0)      # Linear(150,100) -> ReLU

    out = jnp.dot(h.astype(cdt), w4_ref[...], preferred_element_type=jnp.float32)
    o_ref[...] = (out + b4_ref[...]).astype(o_ref.dtype)  # Linear(100, NUM_OUT) logits


def prepare_params(params, compute_dtype=jnp.bfloat16):
    """Zero-pad layer-output dims to lane multiples once at prep time.

    Weights are cast to `compute_dtype`.  bf16 is the default on every chip
    generation: the MXU is bf16-native on v5e/v6e/v7x and it halves weight HBM
    traffic; f32 runs near-f32 accuracy (note: NOT bit-exact vs a CPU/torch
    reference on v6e/v7x, which emulate f32 matmul with multi-pass bf16).
    Biases stay f32 so the elementwise epilogue is f32 on every generation.
    """
    (w1, b1), (w2, b2), (w3, b3), (w4, b4) = params

    def pad2(a, r, c):
        return jnp.pad(a, ((0, r - a.shape[0]), (0, c - a.shape[1])))

    w1p = pad2(w1, IN_DIM, H1_P).astype(compute_dtype)   # K stays 344 (no x pad)
    w2p = pad2(w2, H1_P, H2_P).astype(compute_dtype)
    w3p = pad2(w3, H2_P, H3_P).astype(compute_dtype)
    w4p = pad2(w4, H3_P, OUT_P).astype(compute_dtype)
    b1p = pad2(b1.reshape(1, -1), 1, H1_P).astype(jnp.float32)
    b2p = pad2(b2.reshape(1, -1), 1, H2_P).astype(jnp.float32)
    b3p = pad2(b3.reshape(1, -1), 1, H3_P).astype(jnp.float32)
    b4p = pad2(b4.reshape(1, -1), 1, OUT_P).astype(jnp.float32)
    return (w1p, b1p, w2p, b2p, w3p, b3p, w4p, b4p)


def ft_components_forward(x, prepared_params, *, batch_tile=1024, out_dtype=None):
    """Fused 4-layer MLP forward. x: [B, 344] -> [B, NUM_OUT] in `out_dtype`.

    batch_tile: rows per grid step (sweep 512/1024/2048 for large B).  The tile
    is clamped so that (a) it is a multiple of 8 and (b) the grid has at least
    2 steps whenever B > 8, so the "parallel" axis shards across both v7x
    TensorCores.  No wrapper-side padding/cast of x: the kernel reads x once,
    ragged last block handled by Pallas (rows are independent; OOB output
    writes are masked).  out_dtype defaults to the weight (compute) dtype.
    """
    w1, b1, w2, b2, w3, b3, w4, b4 = prepared_params
    if out_dtype is None:
        out_dtype = w1.dtype

    B = x.shape[0]
    assert x.shape[1] == IN_DIM

    # Tile clamp: >=2 grid steps when possible (v7x megacore), multiple of 8.
    bt = min(int(batch_tile), _round_up(pl.cdiv(max(B, 1), 2), 8))
    bt = max(8, _round_up(bt, 8))
    grid_steps = pl.cdiv(B, bt)

    # Rough per-step VMEM footprint (double-buffered x/out tiles + weights
    # + f32 intermediates).  Only raise the scoped limit when we would exceed
    # v5e's 16 MiB default (v6e/v7x default to 32 MiB).
    w_bytes = sum(int(a.size) * a.dtype.itemsize for a in prepared_params)
    x_tile_bytes = bt * IN_DIM * x.dtype.itemsize
    out_tile_bytes = bt * OUT_P * jnp.dtype(out_dtype).itemsize
    act_bytes = bt * (H1_P + H2_P) * 4
    vmem_est = 2 * (x_tile_bytes + out_tile_bytes + w_bytes) + act_bytes
    vmem_limit = None
    if vmem_est > 12 * 1024 * 1024:
        vmem_limit = min(int(1.5 * vmem_est), 56 * 1024 * 1024)

    # Advisory cost so XLA can overlap this short mem-bound call with neighbors.
    flops = 2 * B * (IN_DIM * H1 + H1 * H2 + H2 * H3 + H3 * NUM_OUT)
    bytes_accessed = (B * IN_DIM * x.dtype.itemsize
                      + B * OUT_P * jnp.dtype(out_dtype).itemsize
                      + w_bytes)
    cost = pl.CostEstimate(flops=flops, transcendentals=0,
                           bytes_accessed=bytes_accessed)

    # Resident (constant-index) blocks: whole padded weight/bias arrays.
    # (<0.5 MB bf16 total, so default double-buffering is negligible VMEM;
    #  pl.Buffered(1) only becomes interesting at batch_tile ~2048 on v7x.)
    full = lambda r, c: pl.BlockSpec((r, c), lambda i: (0, 0))

    out = pl.pallas_call(
        _mlp_kernel,
        out_shape=jax.ShapeDtypeStruct((B, OUT_P), out_dtype),
        grid_spec=pltpu.PrefetchScalarGridSpec(
            num_scalar_prefetch=0,
            grid=(grid_steps,),
            in_specs=[
                pl.BlockSpec((bt, IN_DIM), lambda i: (i, 0)),  # X tile (full 344-wide)
                full(IN_DIM, H1_P), full(1, H1_P),
                full(H1_P, H2_P), full(1, H2_P),
                full(H2_P, H3_P), full(1, H3_P),
                full(H3_P, OUT_P), full(1, OUT_P),
            ],
            out_specs=pl.BlockSpec((bt, OUT_P), lambda i: (i, 0)),
        ),
        compiler_params=pltpu.CompilerParams(
            dimension_semantics=("parallel",),
            vmem_limit_bytes=vmem_limit),
        cost_estimate=cost,
    )(x, w1, b1, w2, b2, w3, b3, w4, b4)

    return out[:B, :NUM_OUT]


def init_params(key):
    """Deterministic init mimicking torch.nn.Linear default U(-1/sqrt(fan_in), +)."""
    dims = [(IN_DIM, H1), (H1, H2), (H2, H3), (H3, NUM_OUT)]
    params = []
    for fan_in, fan_out in dims:
        key, kw, kb = jax.random.split(key, 3)
        bound = 1.0 / jnp.sqrt(float(fan_in))
        w = jax.random.uniform(kw, (fan_in, fan_out), jnp.float32, -bound, bound)
        b = jax.random.uniform(kb, (1, fan_out), jnp.float32, -bound, bound)
        params.append((w, b))
    return params


def _reference_forward(x, params):
    (w1, b1), (w2, b2), (w3, b3), (w4, b4) = params
    h = jnp.maximum(x @ w1 + b1, 0.0)
    h = jnp.maximum(h @ w2 + b2, 0.0)
    h = jnp.maximum(h @ w3 + b3, 0.0)
    return h @ w4 + b4


if __name__ == "__main__":
    key = jax.random.PRNGKey(0)
    key, kx1, kx2 = jax.random.split(key, 3)
    params = init_params(key)

    params_f32 = prepare_params(params, jnp.float32)
    params_bf16 = prepare_params(params)  # bf16 default

    # Small batch (single partial grid step) and a batch that exercises a
    # multi-step grid with a ragged last block (300 = 152 + 148).
    x_small = jax.random.normal(kx1, (8, IN_DIM), jnp.float32)
    x_big = jax.random.normal(kx2, (300, IN_DIM), jnp.float32)

    for x in (x_small, x_big):
        B = x.shape[0]
        ref = _reference_forward(x, params)

        # f32 matmul path (near-f32 accuracy; not bit-exact on v6e/v7x, which
        # emulate f32 matmul via multi-pass bf16).
        out_f32 = ft_components_forward(x, params_f32)
        out_f32 = jax.block_until_ready(out_f32)
        assert out_f32.shape == (B, NUM_OUT)
        assert out_f32.dtype == jnp.float32
        assert jnp.allclose(out_f32, ref, atol=1e-4, rtol=1e-4), "f32 mismatch vs reference"

        # bf16 default path (bf16 weights, bf16 output): loose tolerance.
        out_bf16 = ft_components_forward(x, params_bf16)
        out_bf16 = jax.block_until_ready(out_bf16)
        assert out_bf16.shape == (B, NUM_OUT)
        assert out_bf16.dtype == jnp.bfloat16
        assert jnp.allclose(out_bf16.astype(jnp.float32), ref,
                            atol=5e-2, rtol=5e-2), "bf16 mismatch vs reference"

    print("KERNEL_OK")
</pallas_src>

<mosaic_0001>
module attributes {stable_mosaic.version = 11 : i64} {
  func.func @_mlp_kernel(%arg0: i32, %arg1: memref<8x344xf32, #tpu.memory_space<vmem>>, %arg2: memref<344x256xf32, #tpu.memory_space<vmem>>, %arg3: memref<1x256xf32, #tpu.memory_space<vmem>>, %arg4: memref<256x256xf32, #tpu.memory_space<vmem>>, %arg5: memref<1x256xf32, #tpu.memory_space<vmem>>, %arg6: memref<256x128xf32, #tpu.memory_space<vmem>>, %arg7: memref<1x128xf32, #tpu.memory_space<vmem>>, %arg8: memref<128x128xf32, #tpu.memory_space<vmem>>, %arg9: memref<1x128xf32, #tpu.memory_space<vmem>>, %arg10: memref<8x128xf32, #tpu.memory_space<vmem>>) attributes {dimension_semantics = [#tpu.dimension_semantics<parallel>], iteration_bounds = array<i64: 1>, scalar_prefetch = 0 : i64, scratch_operands = 0 : i64, tpu.core_type = #tpu.core_type<tc>, window_params = [{transform_indices = @transform_0, window_bounds = array<i64: 8, 344>}, {pipeline_mode = #tpu.pipeline_mode<synchronous>, transform_indices = @transform_1, window_bounds = array<i64: 344, 256>}, {pipeline_mode = #tpu.pipeline_mode<synchronous>, transform_indices = @transform_2, window_bounds = array<i64: 1, 256>}, {pipeline_mode = #tpu.pipeline_mode<synchronous>, transform_indices = @transform_3, window_bounds = array<i64: 256, 256>}, {pipeline_mode = #tpu.pipeline_mode<synchronous>, transform_indices = @transform_4, window_bounds = array<i64: 1, 256>}, {pipeline_mode = #tpu.pipeline_mode<synchronous>, transform_indices = @transform_5, window_bounds = array<i64: 256, 128>}, {pipeline_mode = #tpu.pipeline_mode<synchronous>, transform_indices = @transform_6, window_bounds = array<i64: 1, 128>}, {pipeline_mode = #tpu.pipeline_mode<synchronous>, transform_indices = @transform_7, window_bounds = array<i64: 128, 128>}, {pipeline_mode = #tpu.pipeline_mode<synchronous>, transform_indices = @transform_8, window_bounds = array<i64: 1, 128>}, {transform_indices = @transform_9, window_bounds = array<i64: 8, 128>}]} {
    %c0 = arith.constant 0 : index
    %c0_0 = arith.constant 0 : index
    %0 = vector.load %arg1[%c0, %c0_0] : memref<8x344xf32, #tpu.memory_space<vmem>>, vector<8x344xf32>
    %c0_1 = arith.constant 0 : index
    %c0_2 = arith.constant 0 : index
    %1 = vector.load %arg2[%c0_1, %c0_2] : memref<344x256xf32, #tpu.memory_space<vmem>>, vector<344x256xf32>
    %cst = arith.constant dense<0.000000e+00> : vector<8x256xf32>
    %2 = tpu.matmul %0, %1, %cst {dimension_numbers = #tpu.dot_dimension_numbers<[1], [0], [0], [1], [0, 0, 1, 1], [], []>} : vector<8x344xf32>, vector<344x256xf32>, vector<8x256xf32> -> vector<8x256xf32>
    %c0_3 = arith.constant 0 : index
    %c0_4 = arith.constant 0 : index
    %3 = vector.load %arg3[%c0_3, %c0_4] : memref<1x256xf32, #tpu.memory_space<vmem>>, vector<1x256xf32>
    %4 = vector.broadcast %3 : vector<1x256xf32> to vector<8x256xf32>
    %5 = arith.addf %2, %4 : vector<8x256xf32>
    %cst_5 = arith.constant 0.000000e+00 : f32
    %6 = vector.broadcast %cst_5 : f32 to vector<8x256xf32>
    %7 = arith.maximumf %5, %6 : vector<8x256xf32>
    %c0_6 = arith.constant 0 : index
    %c0_7 = arith.constant 0 : index
    %8 = vector.load %arg4[%c0_6, %c0_7] : memref<256x256xf32, #tpu.memory_space<vmem>>, vector<256x256xf32>
    %cst_8 = arith.constant dense<0.000000e+00> : vector<8x256xf32>
    %9 = tpu.matmul %7, %8, %cst_8 {dimension_numbers = #tpu.dot_dimension_numbers<[1], [0], [0], [1], [0, 0, 1, 1], [], []>} : vector<8x256xf32>, vector<256x256xf32>, vector<8x256xf32> -> vector<8x256xf32>
    %c0_9 = arith.constant 0 : index
    %c0_10 = arith.constant 0 : index
    %10 = vector.load %arg5[%c0_9, %c0_10] : memref<1x256xf32, #tpu.memory_space<vmem>>, vector<1x256xf32>
    %11 = vector.broadcast %10 : vector<1x256xf32> to vector<8x256xf32>
    %12 = arith.addf %9, %11 : vector<8x256xf32>
    %cst_11 = arith.constant 0.000000e+00 : f32
    %13 = vector.broadcast %cst_11 : f32 to vector<8x256xf32>
    %14 = arith.maximumf %12, %13 : vector<8x256xf32>
    %c0_12 = arith.constant 0 : index
    %c0_13 = arith.constant 0 : index
    %15 = vector.load %arg6[%c0_12, %c0_13] : memref<256x128xf32, #tpu.memory_space<vmem>>, vector<256x128xf32>
    %cst_14 = arith.constant dense<0.000000e+00> : vector<8x128xf32>
    %16 = tpu.matmul %14, %15, %cst_14 {dimension_numbers = #tpu.dot_dimension_numbers<[1], [0], [0], [1], [0, 0, 1, 1], [], []>} : vector<8x256xf32>, vector<256x128xf32>, vector<8x128xf32> -> vector<8x128xf32>
    %c0_15 = arith.constant 0 : index
    %c0_16 = arith.constant 0 : index
    %17 = vector.load %arg7[%c0_15, %c0_16] : memref<1x128xf32, #tpu.memory_space<vmem>>, vector<1x128xf32>
    %18 = vector.broadcast %17 : vector<1x128xf32> to vector<8x128xf32>
    %19 = arith.addf %16, %18 : vector<8x128xf32>
    %cst_17 = arith.constant 0.000000e+00 : f32
    %20 = vector.broadcast %cst_17 : f32 to vector<8x128xf32>
    %21 = arith.maximumf %19, %20 : vector<8x128xf32>
    %c0_18 = arith.constant 0 : index
    %c0_19 = arith.constant 0 : index
    %22 = vector.load %arg8[%c0_18, %c0_19] : memref<128x128xf32, #tpu.memory_space<vmem>>, vector<128x128xf32>
    %cst_20 = arith.constant dense<0.000000e+00> : vector<8x128xf32>
    %23 = tpu.matmul %21, %22, %cst_20 {dimension_numbers = #tpu.dot_dimension_numbers<[1], [0], [0], [1], [0, 0, 1, 1], [], []>} : vector<8x128xf32>, vector<128x128xf32>, vector<8x128xf32> -> vector<8x128xf32>
    %c0_21 = arith.constant 0 : index
    %c0_22 = arith.constant 0 : index
    %24 = vector.load %arg9[%c0_21, %c0_22] : memref<1x128xf32, #tpu.memory_space<vmem>>, vector<1x128xf32>
    %25 = vector.broadcast %24 : vector<1x128xf32> to vector<8x128xf32>
    %26 = arith.addf %23, %25 : vector<8x128xf32>
    %c0_23 = arith.constant 0 : index
    %c0_24 = arith.constant 0 : index
    %27 = vector.load %arg10[%c0_23, %c0_24] : memref<8x128xf32, #tpu.memory_space<vmem>>, vector<8x128xf32>
    tpu.vector_store %arg10[%c0_23, %c0_24], %26 {strides = array<i32>} : memref<8x128xf32, #tpu.memory_space<vmem>>, vector<8x128xf32>,
    return
  }
  func.func @transform_0(%arg0: i32) -> (i32, i32) {
    %c0_i32 = arith.constant 0 : i32
    %c0_i32_0 = arith.constant 0 : i32
    return %arg0, %c0_i32 : i32, i32
  }
  func.func @transform_1(%arg0: i32) -> (i32, i32) {
    %c0_i32 = arith.constant 0 : i32
    %c0_i32_0 = arith.constant 0 : i32
    %c0_i32_1 = arith.constant 0 : i32
    return %c0_i32, %c0_i32_0 : i32, i32
  }
  func.func @transform_2(%arg0: i32) -> (i32, i32) {
    %c0_i32 = arith.constant 0 : i32
    %c0_i32_0 = arith.constant 0 : i32
    %c0_i32_1 = arith.constant 0 : i32
    return %c0_i32, %c0_i32_0 : i32, i32
  }
  func.func @transform_3(%arg0: i32) -> (i32, i32) {
    %c0_i32 = arith.constant 0 : i32
    %c0_i32_0 = arith.constant 0 : i32
    %c0_i32_1 = arith.constant 0 : i32
    return %c0_i32, %c0_i32_0 : i32, i32
  }
  func.func @transform_4(%arg0: i32) -> (i32, i32) {
    %c0_i32 = arith.constant 0 : i32
    %c0_i32_0 = arith.constant 0 : i32
    %c0_i32_1 = arith.constant 0 : i32
    return %c0_i32, %c0_i32_0 : i32, i32
  }
  func.func @transform_5(%arg0: i32) -> (i32, i32) {
    %c0_i32 = arith.constant 0 : i32
    %c0_i32_0 = arith.constant 0 : i32
    %c0_i32_1 = arith.constant 0 : i32
    return %c0_i32, %c0_i32_0 : i32, i32
  }
  func.func @transform_6(%arg0: i32) -> (i32, i32) {
    %c0_i32 = arith.constant 0 : i32
    %c0_i32_0 = arith.constant 0 : i32
    %c0_i32_1 = arith.constant 0 : i32
    return %c0_i32, %c0_i32_0 : i32, i32
  }
  func.func @transform_7(%arg0: i32) -> (i32, i32) {
    %c0_i32 = arith.constant 0 : i32
    %c0_i32_0 = arith.constant 0 : i32
    %c0_i32_1 = arith.constant 0 : i32
    return %c0_i32, %c0_i32_0 : i32, i32
  }
  func.func @transform_8(%arg0: i32) -> (i32, i32) {
    %c0_i32 = arith.constant 0 : i32
    %c0_i32_0 = arith.constant 0 : i32
    %c0_i32_1 = arith.constant 0 : i32
    return %c0_i32, %c0_i32_0 : i32, i32
  }
  func.func @transform_9(%arg0: i32) -> (i32, i32) {
    %c0_i32 = arith.constant 0 : i32
    %c0_i32_0 = arith.constant 0 : i32
    return %arg0, %c0_i32 : i32, i32
  }
}

</mosaic_0001>

<bundles_post_ra>
// kernel: tpu_custom_call.1
= control target key start
LH: loop header
LB: loop body
LE: loop exit
PB: predicated region body
PF: predicated region fallthrough
CT: control target
= control target key end

     0   :  { %14 = vsyncpa [#allocation3], 0  ;;  %s1349_s0 = inlined_call_operand.hbm [shape: f32[8,344], index: 0, kind: input, shape index: {}]   ;;  %s1350_s1 = inlined_call_operand.hbm [shape: f32[344,256], index: 1, kind: input, shape index: {}]   ;;  %s1351_s2 = inlined_call_operand.vmem [shape: f32[1,256], index: 2, kind: input, shape index: {}]   ;;  %s1352_s3 = inlined_call_operand.hbm [shape: f32[256,256], index: 3, kind: input, shape index: {}]   ;;  %s1353_s4 = inlined_call_operand.vmem [shape: f32[1,256], index: 4, kind: input, shape index: {}]   ;;  %s1354_s5 = inlined_call_operand.hbm [shape: f32[256,128], index: 5, kind: input, shape index: {}]   ;;  %s1355_s6 = inlined_call_operand.vmem [shape: f32[1,128], index: 6, kind: input, shape index: {}]   ;;  %s1356_s7 = inlined_call_operand.hbm [shape: f32[128,128], index: 7, kind: input, shape index: {}]   ;;  %s1357_s8 = inlined_call_operand.vmem [shape: f32[1,128], index: 8, kind: input, shape index: {}]   ;;  %s1358_s9 = inlined_call_operand.hbm [shape: f32[8,128], index: 9, kind: output, shape index: {}]  }
   0x1   :  { %15 = vsyncpa [#allocation6], 0 }
   0x2   :  { %16 = vsyncpa [#allocation9], 0 }
   0x3   :  { %17 = vsyncpa [#allocation4], 0  ;;  %s1169_s30 = smov [#allocation5]   ;;  %s1029_s13 = scalar_lea.hbm %s1350_s1, 11008 }
   0x4   :  { %s33_s10 = sshll.u32 %s1169_s30, 4  ;;  %p1030_p0 = scmp.ne.s32.totalorder %s1350_s1, %s1029_s13  ;;  %s34_s10 = int_to_ptr.vmem [resolvable:$true] %s33_s10 }
   0x5   :  { %p1033_p1 = scmp.lt.u32.totalorder %s1029_s13, %s1350_s1 }
   0x7   :  { %p1035_p2 = pnand %p1033_p1, %p1030_p0 }
   0x9   :  { %1038 = shalt.err (!%p1035_p2)
}
   0xa   :  { %s1039_s18 = scalar_lea.vmem %s34_s10, 11008  ;;  %p1044_p4 = scmp.lt.s32.totalorder %s34_s10, %s34_s10 }
   0xb   :  { %p1040_p3 = scmp.ne.s32.totalorder %s34_s10, %s1039_s18  ;;  %p1045_p5 = scmp.lt.s32.totalorder %s1039_s18, %s1039_s18 }
   0xd   :  { %p1046_p6 = por %p1045_p5, %p1044_p4 }
   0xf   :  { %p1047_p7 = pnand %p1046_p6, %p1040_p3 }
  0x11   :  { %1050 = shalt.err (!%p1047_p7)
}
  0x12   :  { %s1170_s19 = smov 256   ;;  %s1171_s20 = smov 16  }
  0x13   :  { %39 = dma.hbm_to_vmem [thread:$0]  %s1350_s1, 11008, %s34_s10, [#allocation6], %s1170_s19, %s1170_s19, %s1171_s20  }
  0x14   :  { %s1172_s23 = smov [#allocation8]   ;;  %s1051_s27 = scalar_lea.hbm %s1354_s5, 4096 }
  0x15   :  { %s61_s24 = sshll.u32 %s1172_s23, 4  ;;  %p1052_p8 = scmp.ne.s32.totalorder %s1354_s5, %s1051_s27  ;;  %s62_s24 = int_to_ptr.vmem [resolvable:$true] %s61_s24 }
  0x16   :  { %p1055_p9 = scmp.lt.u32.totalorder %s1051_s27, %s1354_s5 }
  0x18   :  { %p1057_p10 = pnand %p1055_p9, %p1052_p8 }
  0x1a   :  { %1060 = shalt.err (!%p1057_p10)
}
  0x1b   :  { %s1061_s12 = scalar_lea.vmem %s62_s24, 4096  ;;  %p1066_p12 = scmp.lt.s32.totalorder %s62_s24, %s62_s24 }
  0x1c   :  { %p1062_p11 = scmp.ne.s32.totalorder %s62_s24, %s1061_s12  ;;  %p1067_p13 = scmp.lt.s32.totalorder %s1061_s12, %s1061_s12 }
  0x1e   :  { %p1068_p0 = por %p1067_p13, %p1066_p12 }
  0x20   :  { %p1069_p1 = pnand %p1068_p0, %p1062_p11 }
  0x22   :  { %1072 = shalt.err (!%p1069_p1)
}
  0x23   :  { %s1173_s1 = smov 128   ;;  %s1174_s10 = smov 8  }
  0x24   :  { %67 = dma.hbm_to_vmem [thread:$0]  %s1354_s5, 4096, %s62_s24, [#allocation9], %s1173_s1, %s1173_s1, %s1174_s10  }
  0x25   :  { %s1175_s15 = smov [#allocation2]   ;;  %s1176_s17 = smov [#allocation7]  }
  0x26   :  { %s24_s16 = sshll.u32 %s1175_s15, 4  ;;  %s47_s18 = sshll.u32 %s1176_s17, 4  ;;  %s25_s16 = int_to_ptr.vmem [resolvable:$true] %s24_s16  ;;  %s1262_s18 = int_to_ptr.vmem [resolvable:$true] %s47_s18 }
  0x27   :  { %s1073_s23 = scalar_lea.hbm %s1349_s0, 384 }
  0x28   :  { %p1074_p2 = scmp.ne.s32.totalorder %s1349_s0, %s1073_s23  ;;  %p1077_p3 = scmp.lt.u32.totalorder %s1073_s23, %s1349_s0 }
  0x2a   :  { %p1079_p4 = pnand %p1077_p3, %p1074_p2 }
  0x2c   :  { %1082 = shalt.err (!%p1079_p4)
}
  0x2d   :  { %s1083_s5 = scalar_lea.vmem %s25_s16, 384  ;;  %p1088_p6 = scmp.lt.s32.totalorder %s25_s16, %s25_s16 }
  0x2e   :  { %p1084_p5 = scmp.ne.s32.totalorder %s25_s16, %s1083_s5  ;;  %p1089_p7 = scmp.lt.s32.totalorder %s1083_s5, %s1083_s5 }
  0x30   :  { %p1090_p8 = por %p1089_p7, %p1088_p6 }
  0x32   :  { %p1091_p9 = pnand %p1090_p8, %p1084_p5 }
  0x34   :  { %1094 = shalt.err (!%p1091_p9)
}
  0x35   :  { %27 = dma.hbm_to_vmem [thread:$0]  %s1349_s0, 384, %s25_s16, [#allocation3]  }
  0x36   :  { %s1095_s12 = scalar_lea.hbm %s1352_s3, 8192 }
  0x37   :  { %p1096_p10 = scmp.ne.s32.totalorder %s1352_s3, %s1095_s12  ;;  %p1099_p11 = scmp.lt.u32.totalorder %s1095_s12, %s1352_s3 }
  0x39   :  { %p1101_p12 = pnand %p1099_p11, %p1096_p10 }
  0x3b   :  { %1104 = shalt.err (!%p1101_p12)
}
  0x3c   :  { %s1105_s21 = scalar_lea.vmem %s1262_s18, 8192  ;;  %p1110_p0 = scmp.lt.s32.totalorder %s1262_s18, %s1262_s18 }
  0x3d   :  { %p1106_p13 = scmp.ne.s32.totalorder %s1262_s18, %s1105_s21  ;;  %p1111_p1 = scmp.lt.s32.totalorder %s1105_s21, %s1105_s21 }
  0x3f   :  { %p1112_p2 = por %p1111_p1, %p1110_p0 }
  0x41   :  { %p1113_p3 = pnand %p1112_p2, %p1106_p13 }
  0x43   :  { %1116 = shalt.err (!%p1113_p3)
}
  0x44   :  { %53 = dma.hbm_to_vmem [thread:$0]  %s1352_s3, 8192, %s1262_s18, [#allocation6], %s1170_s19, %s1170_s19, %s1171_s20  }
  0x45   :  { %s1177_s22 = smov [#allocation10]   ;;  %s1117_s27 = scalar_lea.hbm %s1356_s7, 2048 }
  0x46   :  { %s75_s23 = sshll.u32 %s1177_s22, 4  ;;  %p1118_p4 = scmp.ne.s32.totalorder %s1356_s7, %s1117_s27  ;;  %s76_s23 = int_to_ptr.vmem [resolvable:$true] %s75_s23 }
  0x47   :  { %p1121_p5 = scmp.lt.u32.totalorder %s1117_s27, %s1356_s7 }
  0x49   :  { %p1123_p6 = pnand %p1121_p5, %p1118_p4 }
  0x4b   :  { %1126 = shalt.err (!%p1123_p6)
}
  0x4c   :  { %s1127_s30 = scalar_lea.vmem %s76_s23, 2048  ;;  %p1132_p8 = scmp.lt.s32.totalorder %s76_s23, %s76_s23 }
  0x4d   :  { %p1128_p7 = scmp.ne.s32.totalorder %s76_s23, %s1127_s30  ;;  %p1133_p9 = scmp.lt.s32.totalorder %s1127_s30, %s1127_s30 }
  0x4f   :  { %p1134_p10 = por %p1133_p9, %p1132_p8 }
  0x51   :  { %p1135_p11 = pnand %p1134_p10, %p1128_p7 }
  0x53   :  { %1138 = shalt.err (!%p1135_p11)
}
  0x54   :  { %81 = dma.hbm_to_vmem [thread:$0]  %s1356_s7, 2048, %s76_s23, [#allocation9], %s1173_s1, %s1173_s1, %s1174_s10  }
  0x55   :  { %1161 = dma.done.wait [#allocation3], 384  }
  0x56   :  { %1162 = vsyncadd [#allocation3], 4294966912 }
  0x57   :  { %1163 = dma.done.wait [#allocation6], 19200  }
  0x58   :  { %1164 = vsyncadd [#allocation6], 4294948096 }
  0x59   :  { %1165 = dma.done.wait [#allocation9], 6144  }
  0x5a   :  { %1166 = vsyncadd [#allocation9], 4294961152  ;;  %v103_v0 = vld [vmem:[#allocation5 + $0x8] sm:$0xff]  ;;  %v105_v1 = vld [vmem:[#allocation5 + $0x18] sm:$0xff]  ;;  %vm200_vm0 = vcmask 719872   ;;  %vm1180_vm1 = vmmov 0  }
  0x5b   :  { %v102_v2 = vld [vmem:[#allocation5] sm:$0xff]  ;;  %v808_v3 = vpack.c.bf16 %v105_v1, %v103_v0  ;;  %v104_v4 = vld [vmem:[#allocation5 + $0x10] sm:$0xff]  ;;  %v107_v5 = vld [vmem:[#allocation5 + $0x28] sm:$0xff]  ;;  %s1181_s12 = smov [#allocation11]  }
  0x5c   :  { %v109_v6 = vld [vmem:[#allocation5 + $0x38] sm:$0xff]  ;;  %v810_v7 = vpack.c.bf16 %v104_v4, %v102_v2  ;;  %v106_v9 = vld [vmem:[#allocation5 + $0x20] sm:$0xff]  ;;  %v108_v10 = vld [vmem:[#allocation5 + $0x30] sm:$0xff]  ;;  %s707_s13 = sshll.u32 %s1181_s12, 4  ;;  %s708_s13 = int_to_ptr.vmem [resolvable:$true] %s707_s13 }
  0x5d   :  { %v812_v8 = vpack.c.bf16 %v109_v6, %v107_v5  ;;  %v111_v11 = vld [vmem:[#allocation5 + $0x48] sm:$0xff]  ;;  %809 = vmatprep.subr.bf16.mxu0 %v808_v3  ;;  %v113_v12 = vld [vmem:[#allocation5 + $0x58] sm:$0xff]  ;;  %v814_v13 = vpack.c.bf16 %v108_v10, %v106_v9  ;;  %v110_v15 = vld [vmem:[#allocation5 + $0x40] sm:$0xff]  ;;  %s1139_s14 = scalar_lea.vmem %s708_s13, 128  ;;  %p1144_p13 = scmp.lt.s32.totalorder %s708_s13, %s708_s13 }
  0x5e   :  { %811 = vmatpush1.bf16.msra.mxu0 %v810_v7  ;;  %v816_v14 = vpack.c.bf16 %v113_v12, %v111_v11  ;;  %v112_v16 = vld [vmem:[#allocation5 + $0x50] sm:$0xff]  ;;  %v115_v17 = vld [vmem:[#allocation5 + $0x68] sm:$0xff]  ;;  %v117_v18 = vld [vmem:[#allocation5 + $0x78] sm:$0xff]  ;;  %p1140_p12 = scmp.ne.s32.totalorder %s708_s13, %s1139_s14  ;;  %p1145_p0 = scmp.lt.s32.totalorder %s1139_s14, %s1139_s14 }
  0x5f   :  { %813 = vmatprep.subr.bf16.mxu0 %v812_v8  ;;  %v818_v19 = vpack.c.bf16 %v112_v16, %v110_v15  ;;  %v820_v20 = vpack.c.bf16 %v117_v18, %v115_v17  ;;  %v114_v21 = vld [vmem:[#allocation5 + $0x60] sm:$0xff]  ;;  %v116_v22 = vld [vmem:[#allocation5 + $0x70] sm:$0xff]  ;;  %v119_v23 = vld [vmem:[#allocation5 + $0x88] sm:$0xff] }
  0x60   :  { %v121_v24 = vld [vmem:[#allocation5 + $0x98] sm:$0xff]  ;;  %v822_v25 = vpack.c.bf16 %v116_v22, %v114_v21  ;;  %v118_v27 = vld [vmem:[#allocation5 + $0x80] sm:$0xff]  ;;  %v120_v28 = vld [vmem:[#allocation5 + $0x90] sm:$0xff]  ;;  %p1146_p1 = por %p1145_p0, %p1144_p13 }
  0x61   :  { %v824_v26 = vpack.c.bf16 %v121_v24, %v119_v23  ;;  %v123_v29 = vld [vmem:[#allocation5 + $0xa8] sm:$0xff]  ;;  %v125_v30 = vld [vmem:[#allocation5 + $0xb8] sm:$0xff]  ;;  %v826_v31 = vpack.c.bf16 %v120_v28, %v118_v27  ;;  %v122_v33 = vld [vmem:[#allocation5 + $0xa0] sm:$0xff] }
  0x62   :  { %815 = vmatpush1.bf16.msra.mxu0 %v814_v13  ;;  %v828_v32 = vpack.c.bf16 %v125_v30, %v123_v29  ;;  %v124_v34 = vld [vmem:[#allocation5 + $0xb0] sm:$0xff]  ;;  %v127_v35 = vld [vmem:[#allocation5 + $0xc8] sm:$0xff]  ;;  %v129_v36 = vld [vmem:[#allocation5 + $0xd8] sm:$0xff]  ;;  %p1147_p2 = pnand %p1146_p1, %p1140_p12 }
  0x63   :  { %817 = vmatprep.subr.bf16.mxu0 %v816_v14  ;;  %v830_v37 = vpack.c.bf16 %v124_v34, %v122_v33  ;;  %v832_v38 = vpack.c.bf16 %v129_v36, %v127_v35  ;;  %v126_v39 = vld [vmem:[#allocation5 + $0xc0] sm:$0xff]  ;;  %v128_v40 = vld [vmem:[#allocation5 + $0xd0] sm:$0xff]  ;;  %v131_v42 = vld [vmem:[#allocation5 + $0xe8] sm:$0xff] }
  0x64   :  { %v100_v41 = vld [vmem:[#allocation2 + $0x8] sm:$0xff]  ;;  %v133_v43 = vld [vmem:[#allocation5 + $0xf8] sm:$0xff]  ;;  %v834_v44 = vpack.c.bf16 %v128_v40, %v126_v39  ;;  %v130_v46 = vld [vmem:[#allocation5 + $0xe0] sm:$0xff] }
  0x65   :  { %268 = vmatprep.mubr.f32.mxu0 %v100_v41  ;;  %v836_v45 = vpack.c.bf16 %v133_v43, %v131_v42  ;;  %v132_v47 = vld [vmem:[#allocation5 + $0xf0] sm:$0xff]  ;;  %v135_v48 = vld [vmem:[#allocation5 + $0x108] sm:$0xff]  ;;  %v137_v49 = vld [vmem:[#allocation5 + $0x118] sm:$0xff] }
  0x66   :  { %819 = vmatpush1.bf16.msra.mxu0 %v818_v19  ;;  %v838_v50 = vpack.c.bf16 %v132_v47, %v130_v46  ;;  %v134_v51 = vld [vmem:[#allocation5 + $0x100] sm:$0xff]  ;;  %v136_v52 = vld [vmem:[#allocation5 + $0x110] sm:$0xff]  ;;  %v840_v53 = vpack.c.bf16 %v137_v49, %v135_v48  ;;  %v139_v54 = vld [vmem:[#allocation5 + $0x128] sm:$0xff] }
  0x67   :  { %821 = vmatprep.subr.bf16.mxu0 %v820_v20  ;;  %v141_v55 = vld [vmem:[#allocation5 + $0x138] sm:$0xff]  ;;  %v351_v57 = vld [vmem:[#allocation7 + $0x18] sm:$0xff]  ;;  %v348_v58 = vld [vmem:[#allocation7] sm:$0xff]  ;;  %v842_v1 = vpack.c.bf16 %v136_v52, %v134_v51 }
  0x68   :  { %v349_v56 = vld [vmem:[#allocation7 + $0x8] sm:$0xff]  ;;  %v350_v59 = vld [vmem:[#allocation7 + $0x10] sm:$0xff]  ;;  %v355_v63 = vld [vmem:[#allocation7 + $0x38] sm:$0xff]  ;;  %v844_v6 = vpack.c.bf16 %v141_v55, %v139_v54 }
  0x69   :  { %v892_v60 = vpack.c.bf16 %v351_v57, %v349_v56  ;;  %v894_v61 = vpack.c.bf16 %v350_v59, %v348_v58  ;;  %v353_v62 = vld [vmem:[#allocation7 + $0x28] sm:$0xff]  ;;  %v352_v0 = vld [vmem:[#allocation7 + $0x20] sm:$0xff]  ;;  %v354_v3 = vld [vmem:[#allocation7 + $0x30] sm:$0xff] }
  0x6a   :  { %823 = vmatpush1.bf16.msra.mxu0 %v822_v25  ;;  %v896_v2 = vpack.c.bf16 %v355_v63, %v353_v62  ;;  %v357_v4 = vld [vmem:[#allocation7 + $0x48] sm:$0xff]  ;;  %v359_v5 = vld [vmem:[#allocation7 + $0x58] sm:$0xff]  ;;  %v138_v7 = vld [vmem:[#allocation5 + $0x120] sm:$0xff]  ;;  %v898_v11 = vpack.c.bf16 %v354_v3, %v352_v0 }
  0x6b   :  { %825 = vmatprep.subr.bf16.mxu0 %v824_v26  ;;  %v140_v8 = vld [vmem:[#allocation5 + $0x130] sm:$0xff]  ;;  %893 = vmatprep.subr.bf16.mxu1 %v892_v60  ;;  %v143_v9 = vld [vmem:[#allocation5 + $0x148] sm:$0xff]  ;;  %v145_v10 = vld [vmem:[#allocation5 + $0x158] sm:$0xff]  ;;  %v900_v12 = vpack.c.bf16 %v359_v5, %v357_v4 }
  0x6c   :  { %895 = vmatpush1.bf16.msra.mxu1 %v894_v61  ;;  %v356_v13 = vld [vmem:[#allocation7 + $0x40] sm:$0xff]  ;;  %v358_v14 = vld [vmem:[#allocation7 + $0x50] sm:$0xff]  ;;  %v846_v15 = vpack.c.bf16 %v140_v8, %v138_v7  ;;  %v361_v16 = vld [vmem:[#allocation7 + $0x68] sm:$0xff]  ;;  %v848_v18 = vpack.c.bf16 %v145_v10, %v143_v9 }
  0x6d   :  { %897 = vmatprep.subr.bf16.mxu1 %v896_v2  ;;  %v363_v17 = vld [vmem:[#allocation7 + $0x78] sm:$0xff]  ;;  %v142_v19 = vld [vmem:[#allocation5 + $0x140] sm:$0xff]  ;;  %v144_v20 = vld [vmem:[#allocation5 + $0x150] sm:$0xff]  ;;  %v902_v23 = vpack.c.bf16 %v358_v14, %v356_v13 }
  0x6e   :  { %827 = vmatpush1.bf16.msra.mxu0 %v826_v31  ;;  %v147_v21 = vld [vmem:[#allocation5 + $0x168] sm:$0xff]  ;;  %v149_v22 = vld [vmem:[#allocation5 + $0x178] sm:$0xff]  ;;  %v904_v24 = vpack.c.bf16 %v363_v17, %v361_v16  ;;  %v360_v25 = vld [vmem:[#allocation7 + $0x60] sm:$0xff]  ;;  %v850_v27 = vpack.c.bf16 %v144_v20, %v142_v19 }
  0x6f   :  { %829 = vmatprep.subr.bf16.mxu0 %v828_v32  ;;  %v362_v26 = vld [vmem:[#allocation7 + $0x70] sm:$0xff]  ;;  %v365_v28 = vld [vmem:[#allocation7 + $0x88] sm:$0xff]  ;;  %v367_v29 = vld [vmem:[#allocation7 + $0x98] sm:$0xff]  ;;  %v852_v30 = vpack.c.bf16 %v149_v22, %v147_v21 }
  0x70   :  { %899 = vmatpush1.bf16.msra.mxu1 %v898_v11  ;;  %v146_v31 = vld [vmem:[#allocation5 + $0x160] sm:$0xff]  ;;  %v148_v32 = vld [vmem:[#allocation5 + $0x170] sm:$0xff]  ;;  %v151_v33 = vld [vmem:[#allocation5 + $0x188] sm:$0xff]  ;;  %v906_v35 = vpack.c.bf16 %v362_v26, %v360_v25  ;;  %v908_v36 = vpack.c.bf16 %v367_v29, %v365_v28 }
  0x71   :  { %901 = vmatprep.subr.bf16.mxu1 %v900_v12  ;;  %v153_v34 = vld [vmem:[#allocation5 + $0x198] sm:$0xff]  ;;  %v854_v39 = vpack.c.bf16 %v148_v32, %v146_v31  ;;  %v371_v41 = vld [vmem:[#allocation7 + $0xb8] sm:$0xff]  ;;  %v150_v43 = vld [vmem:[#allocation5 + $0x180] sm:$0xff] }
  0x72   :  { %831 = vmatpush1.bf16.msra.mxu0 %v830_v37  ;;  %v364_v37 = vld [vmem:[#allocation7 + $0x80] sm:$0xff]  ;;  %v369_v40 = vld [vmem:[#allocation7 + $0xa8] sm:$0xff]  ;;  %v856_v42 = vpack.c.bf16 %v153_v34, %v151_v33  ;;  %v154_v55 = vld [vmem:[#allocation5 + $0x1a0] sm:$0xff] }
  0x73   :  { %833 = vmatprep.subr.bf16.mxu0 %v832_v38  ;;  %v366_v38 = vld [vmem:[#allocation7 + $0x90] sm:$0xff]  ;;  %v157_v46 = vld [vmem:[#allocation5 + $0x1b8] sm:$0xff]  ;;  %v912_v48 = vpack.c.bf16 %v371_v41, %v369_v40  ;;  %v368_v49 = vld [vmem:[#allocation7 + $0xa0] sm:$0xff] }
  0x74   :  { %903 = vmatpush1.bf16.msra.mxu1 %v902_v23  ;;  %v910_v47 = vpack.c.bf16 %v366_v38, %v364_v37  ;;  %v373_v52 = vld [vmem:[#allocation7 + $0xc8] sm:$0xff]  ;;  %v156_v56 = vld [vmem:[#allocation5 + $0x1b0] sm:$0xff]  ;;  %v159_v57 = vld [vmem:[#allocation5 + $0x1c8] sm:$0xff] }
  0x75   :  { %905 = vmatprep.subr.bf16.mxu1 %v904_v24  ;;  %v161_v58 = vld [vmem:[#allocation5 + $0x1d8] sm:$0xff]  ;;  %v372_v61 = vld [vmem:[#allocation7 + $0xc0] sm:$0xff]  ;;  %v374_v62 = vld [vmem:[#allocation7 + $0xd0] sm:$0xff]  ;;  %v862_v63 = vpack.c.bf16 %v156_v56, %v154_v55 }
  0x76   :  { %835 = vmatpush1.bf16.msra.mxu0 %v834_v44  ;;  %v152_v44 = vld [vmem:[#allocation5 + $0x190] sm:$0xff]  ;;  %v377_v0 = vld [vmem:[#allocation7 + $0xe8] sm:$0xff]  ;;  %v864_v2 = vpack.c.bf16 %v161_v58, %v159_v57  ;;  %v158_v3 = vld [vmem:[#allocation5 + $0x1c0] sm:$0xff]  ;;  %v918_v7 = vpack.c.bf16 %v374_v62, %v372_v61 }
  0x77   :  { %837 = vmatprep.subr.bf16.mxu0 %v836_v45  ;;  %v155_v45 = vld [vmem:[#allocation5 + $0x1a8] sm:$0xff]  ;;  %v858_v51 = vpack.c.bf16 %v152_v44, %v150_v43  ;;  %v160_v4 = vld [vmem:[#allocation5 + $0x1d0] sm:$0xff]  ;;  %v378_v10 = vld [vmem:[#allocation7 + $0xf0] sm:$0xff] }
  0x78   :  { %907 = vmatpush1.bf16.msra.mxu1 %v906_v35  ;;  %v860_v54 = vpack.c.bf16 %v157_v46, %v155_v45  ;;  %v163_v5 = vld [vmem:[#allocation5 + $0x1e8] sm:$0xff]  ;;  %v376_v9 = vld [vmem:[#allocation7 + $0xe0] sm:$0xff]  ;;  %v866_v11 = vpack.c.bf16 %v160_v4, %v158_v3  ;;  %v381_v12 = vld [vmem:[#allocation7 + $0x108] sm:$0xff] }
  0x79   :  { %909 = vmatprep.subr.bf16.mxu1 %v908_v36  ;;  %v383_v13 = vld [vmem:[#allocation7 + $0x118] sm:$0xff]  ;;  %v164_v16 = vld [vmem:[#allocation5 + $0x1f0] sm:$0xff]  ;;  %v922_v19 = vpack.c.bf16 %v378_v10, %v376_v9  ;;  %v382_v22 = vld [vmem:[#allocation7 + $0x110] sm:$0xff] }
  0x7a   :  { %839 = vmatpush1.bf16.msra.mxu0 %v838_v50  ;;  %v370_v50 = vld [vmem:[#allocation7 + $0xb0] sm:$0xff]  ;;  %v167_v17 = vld [vmem:[#allocation5 + $0x208] sm:$0xff]  ;;  %v924_v20 = vpack.c.bf16 %v383_v13, %v381_v12  ;;  %v380_v21 = vld [vmem:[#allocation7 + $0x100] sm:$0xff] }
  0x7b   :  { %841 = vmatprep.subr.bf16.mxu0 %v840_v53  ;;  %v375_v53 = vld [vmem:[#allocation7 + $0xd8] sm:$0xff]  ;;  %v914_v59 = vpack.c.bf16 %v370_v50, %v368_v49  ;;  %v385_v24 = vld [vmem:[#allocation7 + $0x128] sm:$0xff]  ;;  %v168_v28 = vld [vmem:[#allocation5 + $0x210] sm:$0xff]  ;;  %v926_v31 = vpack.c.bf16 %v382_v22, %v380_v21  ;;  %v1178_v49 = vmov 0.0  }
  0x7c   :  { %911 = vmatpush1.bf16.msra.mxu1 %v910_v47  ;;  %v916_v60 = vpack.c.bf16 %v375_v53, %v373_v52  ;;  %v387_v25 = vld [vmem:[#allocation7 + $0x138] sm:$0xff]  ;;  %v384_v33 = vld [vmem:[#allocation7 + $0x120] sm:$0xff]  ;;  %v386_v34 = vld [vmem:[#allocation7 + $0x130] sm:$0xff] }
  0x7d   :  { %913 = vmatprep.subr.bf16.mxu1 %v912_v48  ;;  %v171_v29 = vld [vmem:[#allocation5 + $0x228] sm:$0xff]  ;;  %v928_v32 = vpack.c.bf16 %v387_v25, %v385_v24  ;;  %v389_v37 = vld [vmem:[#allocation7 + $0x148] sm:$0xff]  ;;  %v170_v40 = vld [vmem:[#allocation5 + $0x220] sm:$0xff]  ;;  %v930_v44 = vpack.c.bf16 %v386_v34, %v384_v33 }
  0x7e   :  { %843 = vmatpush1.bf16.msra.mxu0 %v842_v1  ;;  %v379_v1 = vld [vmem:[#allocation7 + $0xf8] sm:$0xff]  ;;  %v172_v41 = vld [vmem:[#allocation5 + $0x230] sm:$0xff]  ;;  %v177_v43 = vld [vmem:[#allocation5 + $0x258] sm:$0xff] }
  0x7f   :  { %845 = vmatprep.subr.bf16.mxu0 %v844_v6  ;;  %v165_v6 = vld [vmem:[#allocation5 + $0x1f8] sm:$0xff]  ;;  %v920_v8 = vpack.c.bf16 %v379_v1, %v377_v0  ;;  %v99_v35 = vld [vmem:[#allocation2] sm:$0xff]  ;;  %v388_v46 = vld [vmem:[#allocation7 + $0x140] sm:$0xff]  ;;  %v878_v48 = vpack.c.bf16 %v172_v41, %v170_v40 }
  0x80   :  { %915 = vmatpush1.bf16.msra.mxu1 %v914_v59  ;;  %v868_v14 = vpack.c.bf16 %v165_v6, %v163_v5  ;;  %v391_v38 = vld [vmem:[#allocation7 + $0x158] sm:$0xff]  ;;  %v390_v47 = vld [vmem:[#allocation7 + $0x150] sm:$0xff]  ;;  %v393_v50 = vld [vmem:[#allocation7 + $0x168] sm:$0xff] }
  0x81   :  { %917 = vmatprep.subr.bf16.mxu1 %v916_v60  ;;  %v932_v45 = vpack.c.bf16 %v391_v38, %v389_v37  ;;  %v174_v53 = vld [vmem:[#allocation5 + $0x240] sm:$0xff]  ;;  %v179_v55 = vld [vmem:[#allocation5 + $0x268] sm:$0xff]  ;;  %v181_v56 = vld [vmem:[#allocation5 + $0x278] sm:$0xff]  ;;  %v934_v57 = vpack.c.bf16 %v390_v47, %v388_v46 }
  0x82   :  { %847 = vmatpush1.bf16.msra.mxu0 %v846_v15  ;;  %v162_v15 = vld [vmem:[#allocation5 + $0x1e0] sm:$0xff]  ;;  %v392_v59 = vld [vmem:[#allocation7 + $0x160] sm:$0xff]  ;;  %v397_v62 = vld [vmem:[#allocation7 + $0x188] sm:$0xff]  ;;  %v884_v0 = vpack.c.bf16 %v181_v56, %v179_v55 }
  0x83   :  { %849 = vmatprep.subr.bf16.mxu0 %v848_v18  ;;  %v169_v18 = vld [vmem:[#allocation5 + $0x218] sm:$0xff]  ;;  %v870_v23 = vpack.c.bf16 %v164_v16, %v162_v15  ;;  %v394_v60 = vld [vmem:[#allocation7 + $0x170] sm:$0xff]  ;;  %v183_v3 = vld [vmem:[#allocation5 + $0x288] sm:$0xff] }
  0x84   :  { %919 = vmatpush1.bf16.msra.mxu1 %v918_v7  ;;  %v872_v26 = vpack.c.bf16 %v169_v18, %v167_v17  ;;  %v178_v1 = vld [vmem:[#allocation5 + $0x260] sm:$0xff]  ;;  %v185_v4 = vld [vmem:[#allocation5 + $0x298] sm:$0xff]  ;;  %v938_v5 = vpack.c.bf16 %v394_v60, %v392_v59  ;;  %v396_v7 = vld [vmem:[#allocation7 + $0x180] sm:$0xff] }
  0x85   :  { %921 = vmatprep.subr.bf16.mxu1 %v920_v8  ;;  %v398_v8 = vld [vmem:[#allocation7 + $0x190] sm:$0xff]  ;;  %v401_v10 = vld [vmem:[#allocation7 + $0x1a8] sm:$0xff]  ;;  %v888_v12 = vpack.c.bf16 %v185_v4, %v183_v3  ;;  %v400_v17 = vld [vmem:[#allocation7 + $0x1a0] sm:$0xff] }
  0x86   :  { %851 = vmatpush1.bf16.msra.mxu0 %v850_v27  ;;  %v166_v27 = vld [vmem:[#allocation5 + $0x200] sm:$0xff]  ;;  %v942_v15 = vpack.c.bf16 %v398_v8, %v396_v7  ;;  %v407_v21 = vld [vmem:[#allocation7 + $0x1d8] sm:$0xff]  ;;  %v408_v33 = vld [vmem:[#allocation7 + $0x1e0] sm:$0xff] }
  0x87   :  { %853 = vmatprep.subr.bf16.mxu0 %v852_v30  ;;  %v173_v30 = vld [vmem:[#allocation5 + $0x238] sm:$0xff]  ;;  %v874_v36 = vpack.c.bf16 %v168_v28, %v166_v27  ;;  %v182_v13 = vld [vmem:[#allocation5 + $0x280] sm:$0xff]  ;;  %v187_v22 = vld [vmem:[#allocation5 + $0x2a8] sm:$0xff] }
  0x88   :  { %923 = vmatpush1.bf16.msra.mxu1 %v922_v19  ;;  %v402_v18 = vld [vmem:[#allocation7 + $0x1b0] sm:$0xff]  ;;  %v404_v27 = vld [vmem:[#allocation7 + $0x1c0] sm:$0xff]  ;;  %v514_v37 = vld [vmem:[#allocation8 + $0x88] sm:$0xff] }
  0x89   :  { %925 = vmatprep.subr.bf16.mxu1 %v924_v20  ;;  %v405_v20 = vld [vmem:[#allocation7 + $0x1c8] sm:$0xff]  ;;  %v186_v25 = vld [vmem:[#allocation5 + $0x2a0] sm:$0xff]  ;;  %v500_v60 = vld [vmem:[#allocation8 + $0x18] sm:$0xff] }
  0x8a   :  { %855 = vmatpush1.bf16.msra.mxu0 %v854_v39  ;;  %v876_v39 = vpack.c.bf16 %v173_v30, %v171_v29  ;;  %v948_v24 = vpack.c.bf16 %v407_v21, %v405_v20  ;;  %v406_v28 = vld [vmem:[#allocation7 + $0x1d0] sm:$0xff]  ;;  %v409_v30 = vld [vmem:[#allocation7 + $0x1e8] sm:$0xff]  ;;  %v520_v4 = vld [vmem:[#allocation8 + $0xb8] sm:$0xff] }
  0x8b   :  { %857 = vmatprep.subr.bf16.mxu0 %v856_v42  ;;  %v175_v42 = vld [vmem:[#allocation5 + $0x248] sm:$0xff]  ;;  %v950_v29 = vpack.c.bf16 %v406_v28, %v404_v27  ;;  %v410_v34 = vld [vmem:[#allocation7 + $0x1f0] sm:$0xff]  ;;  %v525_v21 = vld [vmem:[#allocation8 + $0xe0] sm:$0xff] }
  0x8c   :  { %927 = vmatpush1.bf16.msra.mxu1 %v926_v31  ;;  %v880_v52 = vpack.c.bf16 %v177_v43, %v175_v42  ;;  %v411_v31 = vld [vmem:[#allocation7 + $0x1f8] sm:$0xff]  ;;  %v499_v59 = vld [vmem:[#allocation8 + $0x10] sm:$0xff] }
  0x8d   :  { %929 = vmatprep.subr.bf16.mxu1 %v928_v32  ;;  %v952_v32 = vpack.c.bf16 %v411_v31, %v409_v30  ;;  %v188_v42 = vld [vmem:[%s1351_s2] sm:$0x3]  ;;  %v519_v3 = vld [vmem:[#allocation8 + $0xb0] sm:$0xff] }
  0x8e   :  { %859 = vmatpush1.bf16.msra.mxu0 %v858_v51  ;;  %v395_v51 = vld [vmem:[#allocation7 + $0x178] sm:$0xff]  ;;  %v503_v7 = vld [vmem:[#allocation8 + $0x30] sm:$0xff] }
  0x8f   :  { %861 = vmatprep.subr.bf16.mxu0 %v860_v54  ;;  %v176_v54 = vld [vmem:[#allocation5 + $0x250] sm:$0xff]  ;;  %v936_v58 = vpack.c.bf16 %v395_v51, %v393_v50  ;;  %v498_v51 = vld [vmem:[#allocation8 + $0x8] sm:$0xff]  ;;  %v504_v8 = vld [vmem:[#allocation8 + $0x38] sm:$0xff] }
  0x90   :  { %931 = vmatpush1.bf16.msra.mxu1 %v930_v44  ;;  %v882_v61 = vpack.c.bf16 %v176_v54, %v174_v53  ;;  %v497_v50 = vld [vmem:[#allocation8] sm:$0xff]  ;;  %v515_v53 = vld [vmem:[#allocation8 + $0x90] sm:$0xff]  ;;  %v516_v54 = vld [vmem:[#allocation8 + $0x98] sm:$0xff] }
  0x91   :  { %933 = vmatprep.subr.bf16.mxu1 %v932_v45  ;;  %v958_v56 = vpack.c.bf16 %v498_v51, %v497_v50  ;;  %v508_v20 = vld [vmem:[#allocation8 + $0x58] sm:$0xff]  ;;  %v527_v28 = vld [vmem:[#allocation8 + $0xf0] sm:$0xff]  ;;  %v615_v51 = vld [vmem:[#allocation10 + $0x40] sm:$0xff] }
  0x92   :  { %863 = vmatpush1.bf16.msra.mxu0 %v862_v63  ;;  %v399_v63 = vld [vmem:[#allocation7 + $0x198] sm:$0xff]  ;;  %v511_v31 = vld [vmem:[#allocation8 + $0x70] sm:$0xff] }
  0x93   :  { %865 = vmatprep.subr.bf16.mxu0 %v864_v2  ;;  %v180_v2 = vld [vmem:[#allocation5 + $0x270] sm:$0xff]  ;;  %v940_v6 = vpack.c.bf16 %v399_v63, %v397_v62  ;;  %v518_v62 = vld [vmem:[#allocation8 + $0xa8] sm:$0xff]  ;;  %v962_v63 = vpack.c.bf16 %v500_v60, %v499_v59 }
  0x94   :  { %935 = vmatpush1.bf16.msra.mxu1 %v934_v57  ;;  %v886_v9 = vpack.c.bf16 %v180_v2, %v178_v1  ;;  %v501_v1 = vld [vmem:[#allocation8 + $0x20] sm:$0xff]  ;;  %v502_v2 = vld [vmem:[#allocation8 + $0x28] sm:$0xff] }
  0x95   :  { %937 = vmatprep.subr.bf16.mxu1 %v936_v58  ;;  %v960_v58 = vpack.c.bf16 %v516_v54, %v515_v53  ;;  %v617_v54 = vld [vmem:[#allocation10 + $0x50] sm:$0xff] }
  0x96   :  { %867 = vmatpush1.bf16.msra.mxu0 %v866_v11  ;;  %v403_v11 = vld [vmem:[#allocation7 + $0x1b8] sm:$0xff] }
  0x97   :  { %869 = vmatprep.subr.bf16.mxu0 %v868_v14  ;;  %v184_v14 = vld [vmem:[#allocation5 + $0x290] sm:$0xff]  ;;  %v944_v16 = vpack.c.bf16 %v403_v11, %v401_v10  ;;  %v522_v10 = vld [vmem:[#allocation8 + $0xc8] sm:$0xff]  ;;  %v970_v11 = vpack.c.bf16 %v504_v8, %v503_v7 }
  0x98   :  { %939 = vmatpush1.bf16.msra.mxu1 %v938_v5  ;;  %v890_v19 = vpack.c.bf16 %v184_v14, %v182_v13  ;;  %v966_v5 = vpack.c.bf16 %v502_v2, %v501_v1  ;;  %v505_v13 = vld [vmem:[#allocation8 + $0x40] sm:$0xff]  ;;  %v506_v14 = vld [vmem:[#allocation8 + $0x48] sm:$0xff] }
  0x99   :  { %941 = vmatprep.subr.bf16.mxu1 %v940_v6  ;;  %v968_v6 = vpack.c.bf16 %v520_v4, %v519_v3  ;;  %v619_v2 = vld [vmem:[#allocation10 + $0x60] sm:$0xff]  ;;  %v620_v3 = vld [vmem:[#allocation10 + $0x68] sm:$0xff] }
  0x9a   :  { %871 = vmatpush1.bf16.msra.mxu0 %v870_v23  ;;  %v946_v23 = vpack.c.bf16 %v402_v18, %v400_v17  ;;  %v974_v17 = vpack.c.bf16 %v506_v14, %v505_v13  ;;  %v1007_v4 = vpack.c.bf16 %v620_v3, %v619_v2 }
  0x9b   :  { %873 = vmatprep.subr.bf16.mxu0 %v872_v26  ;;  %v101_v26 = vld [vmem:[#allocation2 + $0x10] sm:$0xff] }
  0x9c   :  { %943 = vmatpush1.bf16.msra.mxu1 %v942_v15  ;;  %v523_v15 = vld [vmem:[#allocation8 + $0xd0] sm:$0xff] }
  0x9d   :  { %269 = vmatmul.mubr.f32.vlgmr.msra.gmra.mrb[0].mxu0 %v99_v35  ;;  %945 = vmatprep.subr.bf16.mxu1 %v944_v16  ;;  %v954_v35 = vpack.c.bf16 %v410_v34, %v408_v33  ;;  %v524_v16 = vld [vmem:[#allocation8 + $0xd8] sm:$0xff]  ;;  %v607_v34 = vld [vmem:[#allocation10] sm:$0xff] }
  0x9e   :  { %875 = vmatpush1.bf16.msra.mxu0 %v874_v36  ;;  %339 = vmatprep.mubr.f32.mxu0 %v1178_v49  ;;  %v513_v36 = vld [vmem:[#allocation8 + $0x80] sm:$0xff]  ;;  %v976_v18 = vpack.c.bf16 %v524_v16, %v523_v15 }
  0x9f   :  { %877 = vmatprep.subr.bf16.mxu0 %v876_v39  ;;  %v956_v38 = vpack.c.bf16 %v514_v37, %v513_v36  ;;  %v190_v39 = vlaneseq  ;;  %v609_v36 = vld [vmem:[#allocation10 + $0x10] sm:$0xff]  ;;  %v1179_v37 = vmov 0.0|0.0  }
  0xa0   :  { %947 = vmatpush1.bf16.msra.mxu1 %v946_v23 }
  0xa1   :  { %949 = vmatprep.subr.bf16.mxu1 %v948_v24  ;;  %v1312_v40 = vshrl.u32 %v190_v39, 7  ;;  %v610_v39 = vld [vmem:[#allocation10 + $0x18] sm:$0xff] }
  0xa2   :  { %879 = vmatpush1.bf16.msra.mxu0 %v878_v48 }
  0xa3   :  { %881 = vmatprep.subr.bf16.mxu0 %v880_v52  ;;  %v192_v41 = vsub.s32 0, %v1312_v40  ;;  %v196_v43 = vsub.s32 1, %v1312_v40 }
  0xa4   :  { %951 = vmatpush1.bf16.msra.mxu1 %v950_v29  ;;  %v528_v29 = vld [vmem:[#allocation8 + $0xf8] sm:$0xff] }
  0xa5   :  { %953 = vmatprep.subr.bf16.mxu1 %v952_v32  ;;  %v193_v44 = vrot.slane %v188_v42, %v192_v41  ;;  %v197_v45 = vrot.slane %v188_v42, %v196_v43  ;;  %v984_v30 = vpack.c.bf16 %v528_v29, %v527_v28  ;;  %v512_v32 = vld [vmem:[#allocation8 + $0x78] sm:$0xff]  ;;  %v992_v42 = vpack.c.bf16 %v610_v39, %v609_v36 }
  0xa6   :  { %883 = vmatpush1.bf16.msra.mxu0 %v882_v61  ;;  %v517_v61 = vld [vmem:[#allocation8 + $0xa0] sm:$0xff]  ;;  %v986_v33 = vpack.c.bf16 %v512_v32, %v511_v31 }
  0xa7   :  { %885 = vmatprep.subr.bf16.mxu0 %v884_v0  ;;  %v964_v0 = vpack.c.bf16 %v518_v62, %v517_v61 }
  0xa8   :  { %955 = vmatpush1.bf16.msra.mxu1 %v954_v35  ;;  %v608_v35 = vld [vmem:[#allocation10 + $0x8] sm:$0xff] }
  0xa9   :  { %957 = vmatprep.subr.bf16.mxu1 %v956_v38  ;;  %v989_v38 = vpack.c.bf16 %v608_v35, %v607_v34 }
  0xaa   :  { %887 = vmatpush1.bf16.msra.mxu0 %v886_v9  ;;  %v521_v9 = vld [vmem:[#allocation8 + $0xc0] sm:$0xff] }
  0xab   :  { %889 = vmatprep.subr.bf16.mxu0 %v888_v12  ;;  %v972_v12 = vpack.c.bf16 %v522_v10, %v521_v9 }
  0xae   :  { %891 = vmatpush1.bf16.msra.mxu0 %v890_v19  ;;  %v507_v19 = vld [vmem:[#allocation8 + $0x50] sm:$0xff] }
  0xaf   :  { %295 = vmatprep.subr.mxu0 %v187_v22  ;;  %v526_v22 = vld [vmem:[#allocation8 + $0xe8] sm:$0xff]  ;;  %v978_v23 = vpack.c.bf16 %v508_v20, %v507_v19 }
  0xb0   :  { %v980_v24 = vpack.c.bf16 %v526_v22, %v525_v21 }
  0xb2   :  { %296 = vmatpush1.msra.mxu0 %v186_v25  ;;  %v509_v25 = vld [vmem:[#allocation8 + $0x60] sm:$0xff] }
  0xb3   :  { %718 = vmatmul.mubr.msk.f32.vlgmr.msra.gmra.mrb[0].mxu0 %vm200_vm0, %v101_v26  ;;  %v510_v26 = vld [vmem:[#allocation8 + $0x68] sm:$0xff]  ;;  %988 = vmatprep.subr.bf16.mxu0 %v1179_v37 }
  0xb4   :  { %v982_v27 = vpack.c.bf16 %v510_v26, %v509_v25  ;;  %990 = vmatpush3.bf16.msra.mxu0 %v989_v38  ;;  %805 = vmatprep.mubr.msk.f32.mxu0 %vm1180_vm1, %v1178_v49 }
  0xb5   :  { %991 = vmatprep.subr.bf16.mxu0 %v1179_v37 }
  0xb8   :  { %993 = vmatpush3.bf16.msra.mxu0 %v992_v42 }
  0xb9   :  { %994 = vmatprep.subr.bf16.mxu0 %v1179_v37 }
 0x186   :  { %v341_v46 = vpop.f32.mrb[0].mxu0 }
 0x187   :  { %v1012_v47 = vadd.f32 %v341_v46, %v193_v44  ;;  %v343_v48 = vpop.f32.mrb[1].mxu0  ;;  %v611_v44 = vld [vmem:[#allocation10 + $0x20] sm:$0xff] }
 0x188   :  { %v1013_v52 = vadd.f32 %v343_v48, %v197_v45  ;;  %v612_v45 = vld [vmem:[#allocation10 + $0x28] sm:$0xff]  ;;  %v614_v48 = vld [vmem:[#allocation10 + $0x38] sm:$0xff] }
 0x189   :  { %v346_v57 = vmax.f32 %v1012_v47, 0.0  ;;  %v995_v46 = vpack.c.bf16 %v612_v45, %v611_v44  ;;  %v613_v47 = vld [vmem:[#allocation10 + $0x30] sm:$0xff] }
 0x18a   :  { %v347_v55 = vmax.f32 %v1013_v52, 0.0  ;;  %v998_v50 = vpack.c.bf16 %v614_v48, %v613_v47  ;;  %v616_v52 = vld [vmem:[#allocation10 + $0x48] sm:$0xff] }
 0x18b   :  { %996 = vmatpush3.bf16.msra.mxu0 %v995_v46  ;;  %v1001_v53 = vpack.c.bf16 %v616_v52, %v615_v51 }
 0x18c   :  { %488 = vmatprep.mubr.f32.mxu1 %v347_v55  ;;  %997 = vmatprep.subr.bf16.mxu0 %v1179_v37  ;;  %v618_v55 = vld [vmem:[#allocation10 + $0x58] sm:$0xff] }
 0x18d   :  { %489 = vmatmul.mubr.f32.vlgmr.msra.gmra.mrb[0].mxu1 %v346_v57  ;;  %v412_v57 = vld [vmem:[%s1353_s4] sm:$0x3] }
 0x18e   :  { %959 = vmatpush3.bf16.msra.mxu1 %v958_v56  ;;  %v1004_v56 = vpack.c.bf16 %v618_v55, %v617_v54  ;;  %v421_v59 = vrot.slane %v412_v57, %v196_v43 }
 0x18f   :  { %961 = vmatprep.subr.bf16.mxu1 %v960_v58  ;;  %999 = vmatpush3.bf16.msra.mxu0 %v998_v50  ;;  %v417_v58 = vrot.slane %v412_v57, %v192_v41  ;;  %v719_v41 = vld [vmem:[%s1355_s6] ss:$0 sm:$0xff] }
 0x190   :  { %1000 = vmatprep.subr.bf16.mxu0 %v1179_v37 }
 0x192   :  { %963 = vmatpush3.bf16.msra.mxu1 %v962_v63 }
 0x193   :  { %965 = vmatprep.subr.bf16.mxu1 %v964_v0  ;;  %1002 = vmatpush3.bf16.msra.mxu0 %v1001_v53 }
 0x194   :  { %1003 = vmatprep.subr.bf16.mxu0 %v1179_v37 }
 0x196   :  { %967 = vmatpush3.bf16.msra.mxu1 %v966_v5  ;;  %v621_v5 = vld [vmem:[#allocation10 + $0x70] sm:$0xff] }
 0x197   :  { %969 = vmatprep.subr.bf16.mxu1 %v968_v6  ;;  %1005 = vmatpush3.bf16.msra.mxu0 %v1004_v56  ;;  %v622_v6 = vld [vmem:[#allocation10 + $0x78] sm:$0xff] }
 0x198   :  { %1006 = vmatprep.subr.bf16.mxu0 %v1179_v37  ;;  %v1010_v7 = vpack.c.bf16 %v622_v6, %v621_v5 }
 0x19a   :  { %971 = vmatpush3.bf16.msra.mxu1 %v970_v11  ;;  %v720_v11 = vld [vmem:[%s1357_s8] ss:$0 sm:$0xff] }
 0x19b   :  { %973 = vmatprep.subr.bf16.mxu1 %v972_v12  ;;  %1008 = vmatpush3.bf16.msra.mxu0 %v1007_v4 }
 0x19c   :  { %1009 = vmatprep.subr.bf16.mxu0 %v1179_v37 }
 0x19e   :  { %975 = vmatpush3.bf16.msra.mxu1 %v974_v17 }
 0x19f   :  { %977 = vmatprep.subr.bf16.mxu1 %v976_v18  ;;  %1011 = vmatpush3.bf16.msra.mxu0 %v1010_v7 }
 0x1a2   :  { %979 = vmatpush3.bf16.msra.mxu1 %v978_v23 }
 0x1a3   :  { %981 = vmatprep.subr.bf16.mxu1 %v980_v24 }
 0x1a6   :  { %983 = vmatpush3.bf16.msra.mxu1 %v982_v27 }
 0x1a7   :  { %985 = vmatprep.subr.bf16.mxu1 %v984_v30 }
 0x1aa   :  { %987 = vmatpush3.bf16.msra.mxu1 %v986_v33 }
 0x260   :  { %v490_v60 = vpop.f32.mrb[0].mxu1 }
 0x261   :  { %v491_v61 = vadd.f32 %v490_v60, %v417_v58  ;;  %v492_v62 = vpop.f32.mrb[1].mxu1 }
 0x262   :  { %v493_v63 = vadd.f32 %v492_v62, %v421_v59 }
 0x263   :  { %v495_v1 = vmax.f32 %v491_v61, 0.0 }
 0x264   :  { %v496_v0 = vmax.f32 %v493_v63, 0.0 }
 0x266   :  { %600 = vmatprep.mubr.f32.mxu1 %v496_v0 }
 0x267   :  { %601 = vmatmul.mubr.f32.vlgmr.msra.gmra.mrb[2].mxu1 %v495_v1 }
 0x33a   :  { %v753_v40 = vpop.f32.mrb[2].mxu1 }
 0x33b   :  { %v754_v43 = vpop.f32.mrb[3].mxu1 }
 0x33c   :  { %v755_v8 = vadd.f32 %v754_v43, %v753_v40 }
 0x33e   :  { %v603_v9 = vadd.f32 %v755_v8, %v719_v41 }
 0x340   :  { %v606_v10 = vmax.f32 %v603_v9, 0.0 }
 0x342   :  { %806 = vmatmul.mubr.f32.vlgmr.msra.gmra.mrb[2].mxu0 %v606_v10 }
 0x415   :  { %v696_v12 = vpop.f32.mrb[2].mxu0 }
 0x416   :  { %v697_v13 = vadd.f32 %v720_v11, %v696_v12  ;;  %v807_v14 = vpop.f32.mrb[3].mxu0 }
 0x418   :  { %700 = vst [vmem:[#allocation11] sm:$0xff] %v697_v13 }
 0x419   :  { %1150 = shalt.err (!%p1147_p2)
}
 0x41a   :  { %s1151_s17 = scalar_lea.hbm %s1358_s9, 128 }
 0x41b   :  { %p1152_p3 = scmp.ne.s32.totalorder %s1358_s9, %s1151_s17  ;;  %p1155_p4 = scmp.lt.u32.totalorder %s1151_s17, %s1358_s9 }
 0x41d   :  { %p1157_p5 = pnand %p1155_p4, %p1152_p3 }
 0x41f   :  { %1160 = shalt.err (!%p1157_p5)
}
 0x420   :  { %710 = dma.vmem_to_hbm [thread:$0]  %s708_s13, 128, %s1358_s9, [#allocation4]  }
 0x421   :  { %1167 = dma.done.wait [#allocation4], 128  }
 0x422   :  { %1168 = vsyncadd [#allocation4], 4294967168 }
 0x423   :  { %714 = vsyncpa [#allocation3], 1 }
 0x424   :  { %715 = vsyncpa [#allocation6], 1 }
 0x425   :  { %716 = vsyncpa [#allocation9], 1 }
 0x426   :  { %717 = vsyncpa [#allocation4], 1 }

</bundles_post_ra>
